<compile_context>
chip_gen: v6e
topology: v6e:2x2x1
jax: 0.10.0
libtpu: 0.0.40
codegen_flags: <defaults>
</compile_context>

<pallas_src>
import functools

import numpy as np
import jax
import jax.numpy as jnp
from jax import lax
from jax.experimental import pallas as pl
from jax.experimental.pallas import tpu as pltpu


def _pair(v):
    if isinstance(v, (tuple, list)):
        return tuple(v)
    return (v, v)


def _pool_matrix(n_in, k, s, pad, n_out):
    """M[i, o] = 1 if input index i lies inside pooling window o (zero padding)."""
    idx = np.arange(n_in)[:, None]                  # (n_in, 1)
    starts = np.arange(n_out)[None, :] * s - pad    # (1, n_out)
    return ((idx >= starts) & (idx < starts + k)).astype(np.float32)


def _pool_matrix_T(n_in, k, s, pad, n_out):
    """Transposed form, M[o, i] = 1 if input index i lies in window o."""
    starts = np.arange(n_out)[:, None] * s - pad    # (n_out, 1)
    idx = np.arange(n_in)[None, :]                  # (1, n_in)
    return ((idx >= starts) & (idx < starts + k)).astype(np.float32)


def _vmem_budgets():
    """(per-step working-set budget, scoped vmem limit) per TPU generation."""
    cap = None
    try:
        cap = getattr(pltpu.get_tpu_info(), "vmem_capacity_bytes", None)
    except Exception:
        cap = None
    if cap is None:
        cap = 64 << 20                            # conservative: assume v7x (64 MiB / TC)
    if cap >= (100 << 20):                        # v5e / v6e: 128 MiB VMEM
        return 56 << 20, 96 << 20
    return 20 << 20, 48 << 20                     # v7x: 64 MiB VMEM


def _pick_h_tile(oH, C, kh, W, oW, in_itemsize, mm_itemsize, budget_bytes):
    """Output-row tile t_oh (multiple of 8, capped at 32) whose per-step working set fits."""
    f32 = 4

    def est(t):
        rows = t * kh
        b = 2 * C * rows * W * in_itemsize                       # double-buffered input block
        if in_itemsize < f32:
            b += C * rows * W * f32                              # f32 upcast of the block
        b += C * rows * W * f32                                  # xe = xf * e
        b += rows * W * f32                                      # e
        if mm_itemsize < f32:
            b += (C * rows * W + (C + 1) * t * W) * mm_itemsize  # bf16 MXU-operand copies
        b += (C + 1) * t * W * f32                               # H-pooled intermediates
        b += C * t * oW * (f32 + 2 * in_itemsize)                # out accum + dbl-buffered out
        return b

    cap = min(32, oH)
    cands = [t for t in (32, 24, 16, 8) if t <= cap]
    if not cands:
        cands = [oH]                          # tiny oH: single tile
    for t in cands:                           # prefer a divisor of oH (no masked tail)
        if oH % t == 0 and est(t) <= budget_bytes:
            return t
    for t in cands:                           # otherwise the largest tile within budget
        if est(t) <= budget_bytes:
            return t
    return cands[-1]


def softpool2d_kernel(x_ref, phT_ref, pw_ref, o_ref, *,
                      total_rows, rows_in, needs_mask, mm_dtype):
    # x_ref:   (C, rows_in, W)  input rows covering t_oh pooling windows
    # phT_ref: (t_oh, rows_in)  pre-transposed 0/1 row-pooling matrix (mm_dtype)
    # pw_ref:  (W, oW)          0/1 column-pooling matrix (mm_dtype)
    # o_ref:   (C, t_oh, oW)
    x = x_ref[...]

    if needs_mask:
        # The last H tile may read past the end of the image; zero those rows.  They only feed
        # output rows that Pallas discards, but garbage must not poison the block max / exp.
        t = pl.program_id(1)
        valid = total_rows - t * rows_in
        row_idx = lax.broadcasted_iota(jnp.int32, x.shape[1:], 0)        # (rows_in, W)
        x = jnp.where((row_idx < valid)[None, :, :], x, jnp.zeros_like(x))

    # Stable exp: one scalar max per block (native-dtype reduce, then upcast).  exp(-m) is
    # constant over every pooling window of this block, so it cancels exactly in
    # window_sum(x*e) / window_sum(e).
    m = jnp.max(x).astype(jnp.float32)
    xf = x.astype(jnp.float32)
    e = jnp.sum(jnp.exp(xf - m), axis=0)                                 # (rows_in, W), f32 > 0
    xe = xf * e[None, :, :]                                              # (C, rows_in, W), f32

    phT = phT_ref[...]                                                   # mm_dtype (pre-cast)
    pw = pw_ref[...]                                                     # mm_dtype (pre-cast)

    # H-pool first (lane-dense: last dim stays W); MXU operands in mm_dtype, f32 accumulation.
    hp_xe = jnp.einsum('qh,chw->cqw', phT, xe.astype(mm_dtype),
                       preferred_element_type=jnp.float32)               # (C, t_oh, W)
    hp_e = jnp.dot(phT, e.astype(mm_dtype),
                   preferred_element_type=jnp.float32)                   # (t_oh, W)

    # W-pool: one big 2-D MXU matmul for the numerator, one small one for the denominator.
    c, t_oh, w = hp_xe.shape
    num = jnp.dot(hp_xe.reshape(c * t_oh, w).astype(mm_dtype), pw,
                  preferred_element_type=jnp.float32).reshape(c, t_oh, -1)   # (C, t_oh, oW)
    den = jnp.dot(hp_e.astype(mm_dtype), pw,
                  preferred_element_type=jnp.float32)                        # (t_oh, oW)

    # One approx reciprocal per output pixel (EUP) + 2 Newton steps -> ~f32 accuracy, then a
    # broadcast multiply instead of C divides per pixel.
    inv = pl.reciprocal(den, approx=True)
    inv = inv * (2.0 - den * inv)
    inv = inv * (2.0 - den * inv)

    out = jnp.maximum(num * inv[None, :, :], 0.0)
    o_ref[...] = out.astype(o_ref.dtype)


def softpool2d(x, kernel_size=2, stride=None, padding=0):
    kh, kw = _pair(kernel_size)
    sh, sw = _pair(stride) if stride is not None else (kh, kw)
    B, C, H, W = x.shape
    oH = (H + 2 * padding - kh) // sh + 1
    oW = (W + 2 * padding - kw) // sw + 1

    mm_dtype = jnp.bfloat16 if x.dtype == jnp.bfloat16 else jnp.float32
    mm_itemsize = 2 if mm_dtype == jnp.bfloat16 else 4
    tile_budget, vmem_limit = _vmem_budgets()

    # H-tiling without a halo is only valid for non-overlapping, unpadded row windows
    # (the module default: stride == kernel, padding == 0).
    t_oh = None
    if padding == 0 and sh == kh:
        t = _pick_h_tile(oH, C, kh, W, oW, x.dtype.itemsize, mm_itemsize, tile_budget)
        if (t * kh) % 8 == 0 or t * kh == H:     # respect the (8,128) block-shape constraint
            t_oh = t

    if t_oh is None:
        # Whole (C, H, W) image per grid step (general kernel/stride/padding).
        # TODO(synk): halo-tiled path (rows_in = (t_oh-1)*sh + kh) for padding>0 / overlapping
        # strides, so large images stay tiled on v7x as well.
        t_oh, n_th, rows_in = oH, 1, H
        needs_mask = False
        phT = _pool_matrix_T(H, kh, sh, padding, oH)           # (oH, H)
    else:
        rows_in = t_oh * kh
        n_th = -(-oH // t_oh)                                  # cdiv: masked last tile if needed
        needs_mask = n_th * rows_in > H                        # last tile reads past the image
        phT = _pool_matrix_T(rows_in, kh, sh, 0, t_oh)         # identical for every H tile
    pw = _pool_matrix(W, kw, sw, padding, oW)                  # (W, oW)

    # Pre-cast 0/1 pool matrices to the MXU operand dtype (exact in bf16).
    phT = jnp.asarray(phT, dtype=mm_dtype)
    pw = jnp.asarray(pw, dtype=mm_dtype)

    kernel = functools.partial(
        softpool2d_kernel,
        total_rows=H, rows_in=rows_in, needs_mask=needs_mask, mm_dtype=mm_dtype)

    return pl.pallas_call(
        kernel,
        out_shape=jax.ShapeDtypeStruct((B, C, oH, oW), x.dtype),
        grid_spec=pltpu.PrefetchScalarGridSpec(
            num_scalar_prefetch=0,
            grid=(B, n_th),
            in_specs=[
                pl.BlockSpec((None, C, rows_in, W), lambda b, t: (b, 0, t, 0)),
                # Constant block index -> these are not re-DMA'd after the first grid step.
                pl.BlockSpec((t_oh, rows_in), lambda b, t: (0, 0)),
                pl.BlockSpec((W, oW), lambda b, t: (0, 0)),
            ],
            out_specs=pl.BlockSpec((None, C, t_oh, oW), lambda b, t: (b, 0, t, 0)),
        ),
        compiler_params=pltpu.CompilerParams(
            # Disjoint output blocks along both grid axes -> shard across both TensorCores.
            dimension_semantics=("parallel", "parallel"),
            vmem_limit_bytes=vmem_limit,
        ),
    )(x, phT, pw)


def _reference(x, kernel_size=2, stride=None, padding=0):
    # Pure-JAX reference mirroring the PyTorch CPU path (count_include_pad cancellation
    # => ratio of zero-padded window sums, then clamp to [0, inf)).
    kh, kw = _pair(kernel_size)
    sh, sw = _pair(stride) if stride is not None else (kh, kw)
    e = jnp.sum(jnp.exp(x), axis=1, keepdims=True)
    e = jnp.maximum(e, 0.0)
    pad_cfg = [(0, 0), (0, 0), (padding, padding), (padding, padding)]

    def pool_sum(a):
        return lax.reduce_window(a, 0.0, lax.add,
                                 (1, 1, kh, kw), (1, 1, sh, sw), pad_cfg)

    out = pool_sum(x * e) / pool_sum(e)
    return jnp.maximum(out, 0.0)


if __name__ == "__main__":
    key = jax.random.PRNGKey(0)
    x = jax.random.normal(key, (2, 4, 16, 16), dtype=jnp.float32)

    # Module defaults: kernel=2, stride=None (=kernel), padding=0.
    out = jax.block_until_ready(softpool2d(x, kernel_size=2, stride=None, padding=0))
    assert out.shape == (2, 4, 8, 8), out.shape
    ref = _reference(x, kernel_size=2, stride=None, padding=0)
    np.testing.assert_allclose(np.asarray(out), np.asarray(ref), rtol=1e-5, atol=1e-5)

    # Non-default config exercising the padded / overlapping-window (whole-image) path.
    out2 = jax.block_until_ready(softpool2d(x, kernel_size=3, stride=2, padding=1))
    ref2 = _reference(x, kernel_size=3, stride=2, padding=1)
    np.testing.assert_allclose(np.asarray(out2), np.asarray(ref2), rtol=1e-5, atol=1e-5)

    # bf16 input path: bf16 MXU operands for both pooling matmuls, f32 accumulation.
    xb = x.astype(jnp.bfloat16)
    out3 = jax.block_until_ready(softpool2d(xb, kernel_size=2, stride=None, padding=0))
    ref3 = _reference(xb.astype(jnp.float32), kernel_size=2, stride=None, padding=0)
    np.testing.assert_allclose(np.asarray(out3).astype(np.float32), np.asarray(ref3),
                               rtol=5e-2, atol=5e-2)

    # Non-divisor oH (oH=20, t_oh=16): exercises the cdiv grid + masked last H tile.
    x4 = jax.random.normal(jax.random.PRNGKey(1), (1, 4, 40, 16), dtype=jnp.float32)
    out4 = jax.block_until_ready(softpool2d(x4, kernel_size=2, stride=None, padding=0))
    ref4 = _reference(x4, kernel_size=2, stride=None, padding=0)
    np.testing.assert_allclose(np.asarray(out4), np.asarray(ref4), rtol=1e-5, atol=1e-5)

    print("KERNEL_OK")
</pallas_src>

<mosaic_0001>
module attributes {stable_mosaic.version = 11 : i64} {
  func.func @softpool2d_kernel(%arg0: i32, %arg1: i32, %arg2: memref<1x4x16x16xf32, #tpu.memory_space<vmem>>, %arg3: memref<8x16xf32, #tpu.memory_space<vmem>>, %arg4: memref<16x8xf32, #tpu.memory_space<vmem>>, %arg5: memref<1x4x8x8xf32, #tpu.memory_space<vmem>>) attributes {dimension_semantics = [#tpu.dimension_semantics<parallel>, #tpu.dimension_semantics<parallel>], iteration_bounds = array<i64: 2, 1>, scalar_prefetch = 0 : i64, scratch_operands = 0 : i64, tpu.core_type = #tpu.core_type<tc>, window_params = [{transform_indices = @transform_0, window_bounds = array<i64: 1, 4, 16, 16>}, {pipeline_mode = #tpu.pipeline_mode<synchronous>, transform_indices = @transform_1, window_bounds = array<i64: 8, 16>}, {pipeline_mode = #tpu.pipeline_mode<synchronous>, transform_indices = @transform_2, window_bounds = array<i64: 16, 8>}, {transform_indices = @transform_3, window_bounds = array<i64: 1, 4, 8, 8>}]} {
    %c0 = arith.constant 0 : index
    %c0_0 = arith.constant 0 : index
    %c0_1 = arith.constant 0 : index
    %c0_2 = arith.constant 0 : index
    %0 = vector.load %arg2[%c0, %c0_0, %c0_1, %c0_2] : memref<1x4x16x16xf32, #tpu.memory_space<vmem>>, vector<1x4x16x16xf32>
    %1 = vector.shape_cast %0 : vector<1x4x16x16xf32> to vector<4x16x16xf32>
    %2 = vector.shape_cast %1 : vector<4x16x16xf32> to vector<1x4x16x16xf32>
    %cst = arith.constant dense<0xFF800000> : vector<1xf32>
    %3 = vector.multi_reduction <maximumf>, %2, %cst [1, 2, 3] : vector<1x4x16x16xf32> to vector<1xf32>
    %4 = vector.shape_cast %3 : vector<1xf32> to vector<1x1x1x1xf32>
    %5 = vector.extract %4[0, 0, 0, 0] : f32 from vector<1x1x1x1xf32>
    %6 = vector.broadcast %5 : f32 to vector<4x16x16xf32>
    %7 = arith.subf %1, %6 : vector<4x16x16xf32>
    %8 = math.exp %7 : vector<4x16x16xf32>
    %cst_3 = arith.constant dense<0.000000e+00> : vector<16x16xf32>
    %9 = vector.multi_reduction <add>, %8, %cst_3 [0] : vector<4x16x16xf32> to vector<16x16xf32>
    %10 = vector.shape_cast %9 : vector<16x16xf32> to vector<1x16x16xf32>
    %11 = vector.broadcast %10 : vector<1x16x16xf32> to vector<4x16x16xf32>
    %12 = arith.mulf %1, %11 : vector<4x16x16xf32>
    %c0_4 = arith.constant 0 : index
    %c0_5 = arith.constant 0 : index
    %13 = vector.load %arg3[%c0_4, %c0_5] : memref<8x16xf32, #tpu.memory_space<vmem>>, vector<8x16xf32>
    %c0_6 = arith.constant 0 : index
    %c0_7 = arith.constant 0 : index
    %14 = vector.load %arg4[%c0_6, %c0_7] : memref<16x8xf32, #tpu.memory_space<vmem>>, vector<16x8xf32>
    "tpu.trace_start"() <{level = 10 : i32, message = "qh,chw->cqw"}> : () -> ()
    %cst_8 = arith.constant dense<0.000000e+00> : vector<4x16x8xf32>
    %15 = tpu.matmul %12, %13, %cst_8 {dimension_numbers = #tpu.dot_dimension_numbers<[1], [1], [0, 2], [0], [0, 0, 0, 2, 1, 0], [], []>} : vector<4x16x16xf32>, vector<8x16xf32>, vector<4x16x8xf32> -> vector<4x16x8xf32>
    %16 = tpu.transpose %15, [0, 2, 1] : vector<4x16x8xf32> -> vector<4x8x16xf32>
    "tpu.trace_stop"() : () -> ()
    %cst_9 = arith.constant dense<0.000000e+00> : vector<8x16xf32>
    %17 = tpu.matmul %13, %9, %cst_9 {dimension_numbers = #tpu.dot_dimension_numbers<[1], [0], [0], [1], [0, 0, 1, 1], [], []>} : vector<8x16xf32>, vector<16x16xf32>, vector<8x16xf32> -> vector<8x16xf32>
    %18 = vector.shape_cast %16 : vector<4x8x16xf32> to vector<32x16xf32>
    %cst_10 = arith.constant dense<0.000000e+00> : vector<32x8xf32>
    %19 = tpu.matmul %18, %14, %cst_10 {dimension_numbers = #tpu.dot_dimension_numbers<[1], [0], [0], [1], [0, 0, 1, 1], [], []>} : vector<32x16xf32>, vector<16x8xf32>, vector<32x8xf32> -> vector<32x8xf32>
    %20 = vector.shape_cast %19 : vector<32x8xf32> to vector<4x8x8xf32>
    %cst_11 = arith.constant dense<0.000000e+00> : vector<8x8xf32>
    %21 = tpu.matmul %17, %14, %cst_11 {dimension_numbers = #tpu.dot_dimension_numbers<[1], [0], [0], [1], [0, 0, 1, 1], [], []>} : vector<8x16xf32>, vector<16x8xf32>, vector<8x8xf32> -> vector<8x8xf32>
    %22 = tpu.reciprocal %21 {approx = true} : vector<8x8xf32> -> vector<8x8xf32>
    %23 = arith.mulf %21, %22 : vector<8x8xf32>
    %cst_12 = arith.constant 2.000000e+00 : f32
    %24 = vector.broadcast %cst_12 : f32 to vector<8x8xf32>
    %25 = arith.subf %24, %23 : vector<8x8xf32>
    %26 = arith.mulf %22, %25 : vector<8x8xf32>
    %27 = arith.mulf %21, %26 : vector<8x8xf32>
    %cst_13 = arith.constant 2.000000e+00 : f32
    %28 = vector.broadcast %cst_13 : f32 to vector<8x8xf32>
    %29 = arith.subf %28, %27 : vector<8x8xf32>
    %30 = arith.mulf %26, %29 : vector<8x8xf32>
    %31 = vector.shape_cast %30 : vector<8x8xf32> to vector<1x8x8xf32>
    %32 = vector.broadcast %31 : vector<1x8x8xf32> to vector<4x8x8xf32>
    %33 = arith.mulf %20, %32 : vector<4x8x8xf32>
    %cst_14 = arith.constant 0.000000e+00 : f32
    %34 = vector.broadcast %cst_14 : f32 to vector<4x8x8xf32>
    %35 = arith.maximumf %33, %34 : vector<4x8x8xf32>
    %c0_15 = arith.constant 0 : index
    %c0_16 = arith.constant 0 : index
    %c0_17 = arith.constant 0 : index
    %c0_18 = arith.constant 0 : index
    %36 = vector.load %arg5[%c0_15, %c0_16, %c0_17, %c0_18] : memref<1x4x8x8xf32, #tpu.memory_space<vmem>>, vector<1x4x8x8xf32>
    %37 = vector.shape_cast %36 : vector<1x4x8x8xf32> to vector<4x8x8xf32>
    %38 = vector.shape_cast %35 : vector<4x8x8xf32> to vector<1x4x8x8xf32>
    tpu.vector_store %arg5[%c0_15, %c0_16, %c0_17, %c0_18], %38 {strides = array<i32>} : memref<1x4x8x8xf32, #tpu.memory_space<vmem>>, vector<1x4x8x8xf32>,
    return
  }
  func.func @transform_0(%arg0: i32, %arg1: i32) -> (i32, i32, i32, i32) {
    %c0_i32 = arith.constant 0 : i32
    %c0_i32_0 = arith.constant 0 : i32
    %c0_i32_1 = arith.constant 0 : i32
    return %arg0, %c0_i32, %arg1, %c0_i32_0 : i32, i32, i32, i32
  }
  func.func @transform_1(%arg0: i32, %arg1: i32) -> (i32, i32) {
    %c0_i32 = arith.constant 0 : i32
    %c0_i32_0 = arith.constant 0 : i32
    %c0_i32_1 = arith.constant 0 : i32
    return %c0_i32, %c0_i32_0 : i32, i32
  }
  func.func @transform_2(%arg0: i32, %arg1: i32) -> (i32, i32) {
    %c0_i32 = arith.constant 0 : i32
    %c0_i32_0 = arith.constant 0 : i32
    %c0_i32_1 = arith.constant 0 : i32
    return %c0_i32, %c0_i32_0 : i32, i32
  }
  func.func @transform_3(%arg0: i32, %arg1: i32) -> (i32, i32, i32, i32) {
    %c0_i32 = arith.constant 0 : i32
    %c0_i32_0 = arith.constant 0 : i32
    %c0_i32_1 = arith.constant 0 : i32
    return %arg0, %c0_i32, %arg1, %c0_i32_0 : i32, i32, i32, i32
  }
}

</mosaic_0001>

<bundles_post_ra>
// kernel: tpu_custom_call.1
= control target key start
LH: loop header
LB: loop body
LE: loop exit
PB: predicated region body
PF: predicated region fallthrough
CT: control target
= control target key end

     0   :  { %8 = vsyncpa [#allocation3], 0  ;;  %s1593_s0 = inlined_call_operand.hbm [shape: f32[2,4,16,16], index: 0, kind: input, shape index: {}]   ;;  %s1594_s1 = inlined_call_operand.vmem [shape: f32[8,16], index: 1, kind: input, shape index: {}]   ;;  %s1595_s2 = inlined_call_operand.vmem [shape: f32[16,8], index: 2, kind: input, shape index: {}]   ;;  %s1596_s3 = inlined_call_operand.hbm [shape: f32[2,4,8,8], index: 3, kind: output, shape index: {}]  }
   0x1   :  { %10 = vsyncpa [#allocation3 + $0x1], 0 }
   0x2   :  { %11 = vsyncpa [#allocation4], 0 }
   0x3   :  { %13 = vsyncpa [#allocation4 + $0x1], 0  ;;  %s1357_s12 = smov 0   ;;  %s1359_s13 = smov 0  }
   0x4   :  { %s1361_s14 = smov 0   ;;  %s1363_s15 = smov 0  }
   0x5   :  { %s1365_s16 = smov 0   ;;  %s1367_s17 = smov 0  }
   0x6 LB: > { %s1040_s18 = sadd.s32 4294967295, %s1327_s17   ;;  %s1041_s19 = sadd.s32 4294967294, %s1327_s17   ;;  %s1327_s17 = sphi %s1367_s17, %s19_s17   ;;  %s1323_s16 = sphi %s1365_s16, %s1607_s16   ;;  %s1319_s15 = sphi %s1363_s15, %s1606_s15   ;;  %s1315_s14 = sphi %s1361_s14, %s1605_s14   ;;  %s1311_s13 = sphi %s1359_s13, %s1604_s13   ;;  %s1307_s12 = sphi %s1357_s12, %s1603_s12  }
   0x7   : > { %s31_s20 = sadd.s32 1, %s1323_s16  ;;  %s40_s21 = sadd.s32 1, %s1315_s14 }
   0x8   : > { %p33_p0 = scmp.ge.s32.totalorder %s31_s20, 2  ;;  %p47_p1 = scmp.ne.s32.totalorder %s1315_s14, %s1311_s13 }
   0x9   : > { %p48_p2 = scmp.eq.s32.totalorder %s1327_s17, 0  ;;  %p53_p3 = scmp.ne.s32.totalorder %s1311_s13, %s1307_s12 }
   0xa   : > { %s1609_s20 = smov (%p33_p0, %s31_s20), 0  ;;  %p54_p5 = scmp.eq.s32.totalorder %s1040_s18, 0 }
   0xb   : > { %p1398_p4 = por %p48_p2, %p47_p1  ;;  %s35_s23 = ssub.s32 %s1323_s16, %s1609_s20 }
   0xc   : > { %p121_p6 = scmp.eq.s32.totalorder %s1040_s18, 1  ;;  %p38_p7 = scmp.eq.s32.totalorder %s35_s23, 0 }
   0xd   : > { %p1404_p8 = por %p54_p5, %p53_p3  ;;  %p127_p10 = scmp.eq.s32.totalorder %s1041_s19, 1 }
   0xe   : > { %p1408_p9 = por %p121_p6, %p47_p1  ;;  %p1145_p13 = scmp.lt.s32.totalorder %s1327_s17, 2 }
   0xf   : > { %s1413_s26 = scalar_select %p38_p7, %s1315_s14, %s40_s21  }
  0x10   : > { %p1415_p11 = por %p127_p10, %p53_p3  ;;  %s153_s28 = sand.u32 1, %s1315_s14  }
  0x11   : > { %s1044_s29 = sshll.u32 %s153_s28, 6  ;;  %s1070_s30 = sshll.u32 %s1323_s16, 10 }
  0x12   : > { %s165_s6 = scalar_lea.hbm %s1593_s0, %s1070_s30  ;;  %s157_s7 = scalar_lea.vmem [#allocation2], %s1044_s29 }
  0x13   : > { %s166_s8 = sshll.u32 %s157_s7, 4  ;;  %p1428_p0 = pnand %p1145_p13, %p1398_p4  ;;  %s167_s8 = int_to_ptr.vmem [resolvable:$true] %s166_s8 }
  0x14   : > { %p1047_p1 = scmp.ge.s32.totalorder %s1327_s17, 1  ;;  %s154_s10 = scalar_lea.sflag [#allocation3], %s153_s28 }
  0x15   : > { %p1221_p2 = pneg %p1428_p0  ;;  %s1232_s11 = scalar_lea.vmem %s167_s8, 1024 }
  0x16   : > { %p1233_p3 = scmp.ne.s32.totalorder %s167_s8, %s1232_s11  ;;  %s1329_s18 = smov [#allocation2]  }
  0x17   : > { %s1237_s19 = sshll.u32 %s1329_s18, 4  ;;  %s1238_s19 = int_to_ptr.vmem [resolvable:$false] %s1237_s19 }
  0x18   : > { %p1235_p5 = pnand %p1233_p3, %p1221_p2  ;;  %s1239_s21 = scalar_lea.vmem %s1238_s19, 2048 }
  0x19   : > { %p1240_p7 = scmp.lt.s32.totalorder %s167_s8, %s1238_s19  ;;  %p1241_p10 = scmp.lt.s32.totalorder %s1239_s21, %s1232_s11 }
  0x1a   : > { %p1236_p6 = pneg %p1235_p5 }
  0x1b   : > { %p1242_p12 = por %p1241_p10, %p1240_p7 }
  0x1d   : > { %p1243_p4 = pnand %p1242_p12, %p1236_p6 }
  0x1f   : > { %1246 = shalt.err (!%p1243_p4)
}
  0x20   : > { %s1330_s22 = smov 128   ;;  %s1331_s23 = smov 8  }
  0x21   : > { %1140 = dma.hbm_to_vmem [thread:$0]  (!%p1428_p0), %s165_s6, 1024, %s167_s8, %s154_s10, %s1330_s22, %s1330_s22, %s1331_s23  }
  0x22   : > { %p174_p13 = scmp.lt.s32.totalorder %s1327_s17, 3 }
  0x24   : > { %p175_p2 = pnand %p1047_p1, %p174_p13 }
  0x25   : > { %s1441_s28 = sand.u32 (!%p175_p2), 1, %s1311_s13  }
  0x26   : > { %178 = sbr.rel (%p175_p2) target bundleno = 1000 (0x3e8), region = 32  ;;  %s1048_s29 = sshll.u32 (!%p175_p2), %s1441_s28, 6 }
  0x27   : > { %s181_s30 = scalar_lea.sflag (!%p175_p2), [#allocation3], %s1441_s28  ;;  %s184_s4 = scalar_lea.vmem (!%p175_p2), [#allocation2], %s1048_s29 }
  0x2b   : > { %1298 = dma.done.wait (%p1404_p8), %s181_s30, 1024  }
  0x2c   : > { %1300 = vsyncadd (%p1404_p8), %s181_s30, 4294966272  ;;  %vm216_vm0 = vcmask 130048   ;;  %v1449_v0 = vld [vmem:[%s184_s4] sm:$0xff]  ;;  %v1451_v1 = vld [vmem:[%s184_s4 + $0x8] sm:$0xff]  ;;  %v1332_v23 = vmov 0.0   ;;  %vm1333_vm1 = vmmov 0  }
  0x2d   : > { %v1453_v2 = vld [vmem:[%s184_s4 + $0x10] sm:$0xff]  ;;  %v1455_v3 = vld [vmem:[%s184_s4 + $0x18] sm:$0xff]  ;;  %v1457_v4 = vld [vmem:[%s184_s4 + $0x20] sm:$0xff]  ;;  %v217_v6 = vsel %vm216_vm0, %v1449_v0, -inf  ;;  %v218_v7 = vsel %vm216_vm0, %v1451_v1, -inf  ;;  %1107 = vmatprep.subr.mxu1 %v1332_v23  ;;  %1111 = vmatprep.mubr.msk.f32.mxu1 %vm1333_vm1, %v1332_v23  ;;  %s1049_s11 = sshll.u32 %s1441_s28, 5 }
  0x2e   : > { %v1459_v5 = vld [vmem:[%s184_s4 + $0x28] sm:$0xff]  ;;  %v219_v8 = vsel %vm216_vm0, %v1453_v2, -inf  ;;  %v1467_v9 = vld [vmem:[%s184_s4 + $0x30] sm:$0xff]  ;;  %v1469_v10 = vld [vmem:[%s184_s4 + $0x38] sm:$0xff]  ;;  %v220_v11 = vsel %vm216_vm0, %v1455_v3, -inf  ;;  %v221_v12 = vsel %vm216_vm0, %v1457_v4, -inf }
  0x2f   : > { %v223_v13 = vsel %vm216_vm0, %v1459_v5, -inf  ;;  %v222_v14 = vmax.f32 %v217_v6, %v221_v12  ;;  %v225_v16 = vsel %vm216_vm0, %v1467_v9, -inf  ;;  %v227_v17 = vsel %vm216_vm0, %v1469_v10, -inf  ;;  %s1071_s18 = sshll.u32 %s1319_s15, 9  ;;  %s206_s19 = scalar_lea.vmem [#allocation5], %s1049_s11 }
  0x30   : > { %v224_v15 = vmax.f32 %v218_v7, %v223_v13  ;;  %v226_v18 = vmax.f32 %v219_v8, %v225_v16  ;;  %v228_v19 = vmax.f32 %v220_v11, %v227_v17  ;;  %s954_s21 = sshll.u32 %s206_s19, 4  ;;  %vm934_vm2 = vcmask 64512   ;;  %s1543_s29 = scalar_lea.hbm %s1596_s3, %s1071_s18  ;;  %s1545_s21 = int_to_ptr.vmem [resolvable:$true] %s954_s21 }
  0x31   : > { %s940_s15 = scalar_lea.sflag [#allocation4], %s1441_s28  ;;  %s1247_s30 = scalar_lea.vmem %s1545_s21, 512 }
  0x32   : > { %v229_v20 = vmax.f32 %v222_v14, %v224_v15  ;;  %v230_v21 = vmax.f32 %v226_v18, %v228_v19  ;;  %v288_v14 = vld [vmem:[%s1594_s1] sm:$0xff]  ;;  %p1248_p8 = scmp.ne.s32.totalorder %s1545_s21, %s1247_s30  ;;  %s1334_s4 = smov [#allocation5]  }
  0x33   : > { %1093 = vmatprep.subr.msk.mxu0 %vm216_vm0, %v288_v14 }
  0x34   : > { %v231_v22 = vmax.f32 %v229_v20, %v230_v21  ;;  %1094 = vmatpush3.xpose.msk.msra.mxu0 %vm216_vm0, %v288_v14  ;;  %p1249_p12 = pnand %p1248_p8, %p1408_p9 }
  0x36   : > { %232 = vmax.xlane.f32.xlu0 %v231_v22  ;;  %p1250_p0 = pneg %p1249_p12 }
  0xbf   : > { %v233_v24 = vpop.xlane.xlu0 %232 }
  0xc0   : > { %v234_v25 = vrot.slane %v233_v24, 4 }
  0xc2   : > { %v235_v26 = vmax.f32 %v233_v24, %v234_v25  ;;  %v290_v24 = vld [vmem:[%s1595_s2 + $0x8] sm:$0xff]  ;;  %v289_v25 = vld [vmem:[%s1595_s2] sm:$0xff] }
  0xc4   : > { %v236_v27 = vrot.slane %v235_v26, 2 }
  0xc6   : > { %v237_v28 = vmax.f32 %v235_v26, %v236_v27 }
  0xc8   : > { %v238_v29 = vrot.slane %v237_v28, 1 }
  0xca   : > { %v239_v30 = vmax.f32 %v237_v28, %v238_v29 }
  0xcc   : > { %1131 = vpush %v239_v30 }
  0xfd   : > { %s1132_s24 = spop %1131 }
  0xfe   : > { %v241_v31 = vstv %s1132_s24  ;;  %s1251_s24 = sshll.u32 %s1334_s4, 4  ;;  %s1252_s24 = int_to_ptr.vmem [resolvable:$false] %s1251_s24 }
  0xff   : > { %v242_v32 = vsub.f32 %v1449_v0, %v241_v31  ;;  %v243_v33 = vsub.f32 %v1451_v1, %v241_v31  ;;  %v244_v34 = vsub.f32 %v1453_v2, %v241_v31  ;;  %v245_v35 = vsub.f32 %v1455_v3, %v241_v31  ;;  %s1253_s5 = scalar_lea.vmem %s1252_s24, 1024  ;;  %p1254_p1 = scmp.lt.s32.totalorder %s1545_s21, %s1252_s24 }
 0x100   : > { %v246_v36 = vsub.f32 %v1457_v4, %v241_v31  ;;  %v247_v37 = vsub.f32 %v1459_v5, %v241_v31  ;;  %v248_v38 = vsub.f32 %v1467_v9, %v241_v31  ;;  %v249_v42 = vsub.f32 %v1469_v10, %v241_v31  ;;  %p1255_p3 = scmp.lt.s32.totalorder %s1253_s5, %s1247_s30 }
 0x101   : > { %v250_v39 = vmul.f32 1.442695, %v242_v32  ;;  %v252_v40 = vmul.f32 1.442695, %v243_v33  ;;  %v254_v41 = vmul.f32 1.442695, %v244_v34 }
 0x102   : > { %v256_v43 = vmul.f32 1.442695, %v245_v35  ;;  %v258_v44 = vmul.f32 1.442695, %v246_v36  ;;  %v260_v45 = vmul.f32 1.442695, %v247_v37  ;;  %p1256_p5 = por %p1255_p3, %p1254_p1 }
 0x103   : > { %1201 = vpow2.f32 %v250_v39  ;;  %v262_v46 = vmul.f32 1.442695, %v248_v38  ;;  %v264_v47 = vmul.f32 1.442695, %v249_v42 }
 0x104   : > { %1203 = vpow2.f32 %v252_v40  ;;  %p1257_p6 = pnand %p1256_p5, %p1250_p0 }
 0x105   : > { %1205 = vpow2.f32 %v254_v41 }
 0x106   : > { %1207 = vpow2.f32 %v256_v43 }
 0x107   : > { %1209 = vpow2.f32 %v258_v44 }
 0x108   : > { %1211 = vpow2.f32 %v260_v45 }
 0x109   : > { %1213 = vpow2.f32 %v262_v46 }
 0x10a   : > { %1215 = vpow2.f32 %v264_v47 }
 0x110   : > { %v1202_v48 = vpop.eup %1201 }
 0x111   : > { %v1204_v49 = vpop.eup %1203  ;;  %v266_v50 = vsel %vm216_vm0, %v1202_v48, 0.0 }
 0x112   : > { %v1206_v51 = vpop.eup %1205  ;;  %v273_v52 = vsel %vm216_vm0, %v1204_v49, 0.0 }
 0x113   : > { %v1208_v53 = vpop.eup %1207  ;;  %v267_v54 = vsel %vm216_vm0, %v1206_v51, 0.0 }
 0x114   : > { %v1210_v55 = vpop.eup %1209  ;;  %v274_v56 = vsel %vm216_vm0, %v1208_v53, 0.0  ;;  %v268_v57 = vadd.f32 %v267_v54, %v266_v50 }
 0x115   : > { %v1212_v58 = vpop.eup %1211  ;;  %v275_v59 = vadd.f32 %v274_v56, %v273_v52  ;;  %v269_v60 = vsel %vm216_vm0, %v1210_v55, 0.0 }
 0x116   : > { %v1214_v61 = vpop.eup %1213  ;;  %v276_v62 = vsel %vm216_vm0, %v1212_v58, 0.0  ;;  %v270_v63 = vadd.f32 %v269_v60, %v268_v57 }
 0x117   : > { %v1216_v6 = vpop.eup %1215  ;;  %v277_v7 = vadd.f32 %v276_v62, %v275_v59  ;;  %v271_v8 = vsel %vm216_vm0, %v1214_v61, 0.0 }
 0x118   : > { %v278_v11 = vsel %vm216_vm0, %v1216_v6, 0.0  ;;  %v272_v12 = vadd.f32 %v271_v8, %v270_v63 }
 0x119   : > { %v279_v13 = vadd.f32 %v278_v11, %v277_v7 }
 0x11a   : > { %v282_v15 = vmul.f32 %v272_v12, %v1453_v2  ;;  %v280_v16 = vmul.f32 %v272_v12, %v1449_v0  ;;  %v284_v2 = vmul.f32 %v272_v12, %v1457_v4  ;;  %v286_v19 = vmul.f32 %v272_v12, %v1467_v9 }
 0x11b   : > { %1108 = vmatpush3.msra.mxu1 %v279_v13  ;;  %v283_v17 = vmul.f32 %v279_v13, %v1455_v3  ;;  %v281_v18 = vmul.f32 %v279_v13, %v1451_v1  ;;  %v285_v0 = vmul.f32 %v279_v13, %v1459_v5  ;;  %v287_v20 = vmul.f32 %v279_v13, %v1469_v10 }
 0x11c   : > { %1109 = vmatprep.subr.mxu1 %v1332_v23  ;;  %323 = vxpose.xlu1.b32.start [1/2] (short) (narrow) %v282_v15, 16 }
 0x11d   : > { %1110 = vmatpush3.msra.mxu1 %v272_v12  ;;  %291 = vxpose.xlu0.b32.start [1/2] (short) (narrow) %v280_v16, 16 }
 0x11e   : > { %1112 = vmatmul.mubr.msk.f32.vlgmr.msra.gmra.mxu1 %vm216_vm0, %v288_v14  ;;  %1114 = vmatprep.subr.mxu1 %v290_v24 }
 0x11f   : > { %1115 = vmatpush3.msra.mxu1 %v290_v24 }
 0x120   : > { %324 = vxpose.xlu1.b32.end [2/2] (short) (narrow) %v283_v17, 16  ;;  %1116 = vmatprep.subr.mxu1 %v289_v25 }
 0x121   : > { %292 = vxpose.xlu0.b32.end [2/2] (short) (narrow) %v281_v18, 16  ;;  %1117 = vmatpush3.msra.mxu1 %v289_v25 }
 0x122   : > { %1124 = vmatprep.subr.mxu1 %v1332_v23 }
 0x124   : > { %355 = vxpose.xlu1.b32.start [1/2] (short) (narrow) %v284_v2, 16 }
 0x128   : > { %356 = vxpose.xlu1.b32.end [2/2] (short) (narrow) %v285_v0, 16 }
 0x12c   : > { %387 = vxpose.xlu1.b32.start [1/2] (short) (narrow) %v286_v19, 16 }
 0x130   : > { %388 = vxpose.xlu1.b32.end [2/2] (short) (narrow) %v287_v20, 16 }
 0x198   : > { %v339_v1 = vpop.trf.xlu1 }
 0x199   : > { %v307_v3 = vpop.trf.xlu0 }
 0x19a   : > { %1095 = vmatprep.mubr.msk.f32.mxu0 %vm216_vm0, %v307_v3 }
 0x19c   : > { %v340_v4 = vpop.trf.xlu1 }
 0x19d   : > { %v308_v21 = vpop.trf.xlu0 }
 0x19e   : > { %1096 = vmatmul.mubr.msk.f32.vlgmr.msra.gmra.mxu0 %vm216_vm0, %v308_v21 }
 0x19f   : > { %1098 = vmatprep.mubr.msk.f32.mxu0 %vm216_vm0, %v339_v1 }
 0x1a0   : > { %v371_v5 = vpop.trf.xlu1 }
 0x1a2   : > { %1099 = vmatmul.mubr.msk.f32.gmra.mxu0 %vm216_vm0, %v340_v4 }
 0x1a3   : > { %1101 = vmatprep.mubr.msk.f32.mxu0 %vm216_vm0, %v371_v5 }
 0x1a4   : > { %v372_v9 = vpop.trf.xlu1 }
 0x1a6   : > { %1102 = vmatmul.mubr.msk.f32.gmra.mxu0 %vm216_vm0, %v372_v9 }
 0x1a8   : > { %v403_v10 = vpop.trf.xlu1 }
 0x1a9   : > { %1104 = vmatprep.mubr.msk.f32.mxu0 %vm216_vm0, %v403_v10 }
 0x1ac   : > { %v404_v22 = vpop.trf.xlu1 }
 0x1ad   : > { %1105 = vmatmul.mubr.msk.f32.gmra.mxu0 %vm216_vm0, %v404_v22 }
 0x1de   : > { %v745_v33 = vpop.f32.mrf.mxu1 }
 0x1e0   : > { %v1113_v35 = vpop.f32.mrf.mxu1 }
 0x25e   : > { %v1097_v26 = vpop.f32.mrf.mxu0 }
 0x260   : > { %v512_v27 = vpop.f32.mrf.mxu0 }
 0x261   : > { %551 = vxpose.xlu1.b32.start [1/2] (short) (narrow) %v512_v27, 8 }
 0x262   : > { %v1100_v28 = vpop.f32.mrf.mxu0 }
 0x264   : > { %v522_v29 = vpop.f32.mrf.mxu0 }
 0x265   : > { %552 = vxpose.xlu1.b32.end [2/2] (short) (narrow) %v1097_v26, 8 }
 0x266   : > { %v1103_v30 = vpop.f32.mrf.mxu0 }
 0x268   : > { %v532_v31 = vpop.f32.mrf.mxu0 }
 0x269   : > { %583 = vxpose.xlu1.b32.start [1/2] (short) (narrow) %v522_v29, 8 }
 0x26d   : > { %584 = vxpose.xlu1.b32.end [2/2] (short) (narrow) %v1100_v28, 8  ;;  %v1106_v32 = vpop.f32.mrf.mxu0 }
 0x26f   : > { %v542_v34 = vpop.f32.mrf.mxu0 }
 0x271   : > { %615 = vxpose.xlu1.b32.start [1/2] (short) (narrow) %v532_v31, 8 }
 0x275   : > { %616 = vxpose.xlu1.b32.end [2/2] (short) (narrow) %v1103_v30, 8 }
 0x279   : > { %647 = vxpose.xlu1.b32.start [1/2] (short) (narrow) %v542_v34, 8 }
 0x27d   : > { %648 = vxpose.xlu1.b32.end [2/2] (short) (narrow) %v1106_v32, 8 }
 0x2dd   : > { %v567_v36 = vpop.trf.xlu1 }
 0x2de   : > { %1118 = vmatprep.mubr.msk.f32.mxu1 %vm216_vm0, %v567_v36 }
 0x2e5   : > { %v599_v37 = vpop.trf.xlu1 }
 0x2e6   : > { %1119 = vmatmul.mubr.msk.f32.vlgmr.msra.gmra.mxu1 %vm216_vm0, %v599_v37 }
 0x2e7   : > { %1125 = vmatpush3.msra.mxu1 %v290_v24 }
 0x2e8   : > { %1126 = vmatprep.subr.mxu1 %v1332_v23 }
 0x2e9   : > { %1127 = vmatpush3.msra.mxu1 %v289_v25 }
 0x2ed   : > { %v631_v38 = vpop.trf.xlu1 }
 0x2ee   : > { %1121 = vmatprep.mubr.msk.f32.mxu1 %vm216_vm0, %v631_v38 }
 0x2f5   : > { %v663_v39 = vpop.trf.xlu1 }
 0x2f6   : > { %1122 = vmatmul.mubr.msk.f32.gmra.mxu1 %vm216_vm0, %v663_v39 }
 0x2f7   : > { %1128 = vmatprep.mubr.msk.f32.mxu1 %vm1333_vm1, %v1332_v23 }
 0x2fa   : > { %1129 = vmatmul.mubr.msk.f32.vlgmr.msra.gmra.mxu1 %vm216_vm0, %v745_v33 }
 0x3a6   : > { %v1120_v40 = vpop.f32.mrf.mxu1 }
 0x3a8   : > { %v827_v41 = vpop.f32.mrf.mxu1 }
 0x3b6   : > { %v1123_v42 = vpop.f32.mrf.mxu1 }
 0x3b8   : > { %v837_v43 = vpop.f32.mrf.mxu1 }
 0x3ba   : > { %v915_v44 = vpop.f32.mrf.mxu1 }
 0x3bb   : > { %1217 = vrcp.f32 %v915_v44 }
 0x3bc   : > { %v1130_v45 = vpop.f32.mrf.mxu1 }
 0x3c8   : > { %v1218_v46 = vpop.eup %1217 }
 0x3c9   : > { %v920_v47 = vmul.f32 %v1218_v46, %v915_v44 }
 0x3cb   : > { %v921_v48 = vsub.f32 2.0, %v920_v47 }
 0x3cd   : > { %v922_v49 = vmul.f32 %v1218_v46, %v921_v48 }
 0x3cf   : > { %v923_v50 = vmul.f32 %v922_v49, %v915_v44 }
 0x3d1   : > { %v924_v51 = vsub.f32 2.0, %v923_v50 }
 0x3d3   : > { %v925_v52 = vmul.f32 %v924_v51, %v922_v49 }
 0x3d5   : > { %v926_v23 = vmul.f32 %v925_v52, %v827_v41  ;;  %v927_v53 = vmul.f32 %v1120_v40, %v925_v52  ;;  %v928_v54 = vmul.f32 %v925_v52, %v837_v43  ;;  %v929_v55 = vmul.f32 %v1123_v42, %v925_v52 }
 0x3d7   : > { %v930_v56 = vmax.f32 %v926_v23, 0.0  ;;  %v931_v57 = vmax.f32 %v927_v53, 0.0  ;;  %v932_v58 = vmax.f32 %v928_v54, 0.0  ;;  %v933_v59 = vmax.f32 %v929_v55, 0.0 }
 0x3d9   : > { %935 = vst.msk [vmem:[%s206_s19] sm:$0xff] %vm934_vm2, %v930_v56  ;;  %936 = vst.msk [vmem:[%s206_s19 + $0x8] sm:$0xff] %vm934_vm2, %v931_v57 }
 0x3da   : > { %937 = vst.msk [vmem:[%s206_s19 + $0x10] sm:$0xff] %vm934_vm2, %v932_v58  ;;  %938 = vst.msk [vmem:[%s206_s19 + $0x18] sm:$0xff] %vm934_vm2, %v933_v59 }
 0x3db   : > { %1260 = shalt.err (!%p1257_p6)
}
 0x3dc   : > { %s1261_s6 = scalar_lea.hbm %s1543_s29, 512  ;;  %s1265_s9 = scalar_lea.hbm %s1596_s3, 1024 }
 0x3dd   : > { %p1262_p7 = scmp.ne.s32.totalorder %s1543_s29, %s1261_s6  ;;  %p1266_p13 = scmp.lt.s32.totalorder %s1543_s29, %s1596_s3 }
 0x3de   : > { %p1267_p2 = scmp.lt.s32.totalorder %s1265_s9, %s1261_s6 }
 0x3df   : > { %p1263_p10 = pnand %p1262_p7, %p1408_p9 }
 0x3e0   : > { %p1268_p8 = por %p1267_p2, %p1266_p13 }
 0x3e1   : > { %p1264_p4 = pneg %p1263_p10 }
 0x3e3   : > { %p1269_p12 = pnand %p1268_p8, %p1264_p4 }
 0x3e5   : > { %1272 = shalt.err (!%p1269_p12)
}
 0x3e6   : > { %s1335_s18 = smov 128   ;;  %s1336_s19 = smov 8  }
 0x3e7   : > { %1135 = dma.vmem_to_hbm [thread:$0]  (%p1408_p9), %s1545_s21, 512, %s1543_s29, %s940_s15, %s1335_s18, %s1335_s18, %s1336_s19  }
 0x3e8 PF: > { %s969_s22 = sand.u32 1, %s1307_s12   ;;  %p1602_p0 = scmp.ge.s32.totalorder %s1327_s17, 2 }
 0x3e9   : > { %s970_s23 = scalar_lea.sflag [#allocation4], %s969_s22 }
 0x3ea   : > { %p1142_p1 = pnand %p1602_p0, %p1415_p11 }
 0x3ec   : > { %p1143_p3 = pneg %p1142_p1 }
 0x3ee   : > { %1302 = dma.done.wait (%p1143_p3), %s970_s23, 512  }
 0x3ef   : > { %1304 = vsyncadd (%p1143_p3), %s970_s23, 4294966784  ;;  %s19_s17 = sadd.s32 1, %s1327_s17   ;;  %s1603_s12 = smov %s1311_s13 }
 0x3f0   : > { %p16_p5 = scmp.ge.s32.totalorder %s19_s17, 4   ;;  %s1604_s13 = smov %s1315_s14 }
 0x3f1   : > { %s1605_s14 = smov %s1413_s26  ;;  %s1606_s15 = smov %s1323_s16 }
 0x3f2   : > { %s1607_s16 = smov %s1609_s20  ;;  %18 = sbr.rel (!%p16_p5) target bundleno = 6 (0x6), region = 77 }
 0x3f7   :  { %975 = vsyncpa [#allocation3], 1 }
 0x3f8   :  { %977 = vsyncpa [#allocation3 + $0x1], 1 }
 0x3f9   :  { %978 = vsyncpa [#allocation4], 1 }
 0x3fa   :  { %980 = vsyncpa [#allocation4 + $0x1], 1 }

</bundles_post_ra>
